<compile_context>
chip_gen: v6e
topology: v6e:2x2x1
jax: 0.10.0
libtpu: 0.0.40
codegen_flags: <defaults>
</compile_context>

<pallas_src>
import functools

import jax
import jax.numpy as jnp
from jax import lax
from jax.experimental import pallas as pl
from jax.experimental.pallas import tpu as pltpu

EPS = 1e-5   # PyTorch BatchNorm2d default eps
LANE = 128   # TPU lane width


def _round_up(x, m):
    return ((x + m - 1) // m) * m


@functools.lru_cache(maxsize=None)
def _vmem_limit_bytes():
    cap = 64 * 1024 * 1024          # conservative default (v7x physical VMEM)
    try:
        cap = int(pltpu.get_tpu_info().vmem_capacity_bytes)
    except Exception:
        pass
    return int(cap * 3 // 4)


# ---------------- Pallas kernels ----------------

def _matmul_bn_kernel(x_ref, w_ref, shift_ref, o_ref, *, relu):
    # x: (TM, Cin) bf16, w: (Cin, Cout) bf16 (block-diag, BN scale folded),
    # shift: (1, Cout) f32.  y = x @ w + shift [+ relu], f32 accumulation.
    y = jnp.dot(x_ref[...], w_ref[...], preferred_element_type=jnp.float32)
    y = y + shift_ref[...]
    if relu:
        y = jnp.maximum(y, 0.0)
    o_ref[...] = y.astype(o_ref.dtype)


def _matmul_bn_res_kernel(x_ref, w_ref, shift_ref, res_ref, o_ref, *, relu):
    # Same as above plus fused residual add (+ReLU) epilogue.
    y = jnp.dot(x_ref[...], w_ref[...], preferred_element_type=jnp.float32)
    y = y + shift_ref[...] + res_ref[...].astype(jnp.float32)
    if relu:
        y = jnp.maximum(y, 0.0)
    o_ref[...] = y.astype(o_ref.dtype)


def _dw3x3_s1_kernel(x_ref, w_ref, shift_ref, o_ref, pad_ref, *, relu):
    # 3x3 depthwise, stride 1, pad=1.  Halo handled in a VMEM scratch so the
    # wrapper never writes a padded activation to HBM.  Border is re-zeroed
    # every grid step (cheap, and safe under megacore grid sharding).
    H, W = x_ref.shape[1], x_ref.shape[2]
    Hp, Wp, TC = pad_ref.shape
    zrow = jnp.zeros((1, Wp, TC), pad_ref.dtype)
    zcol = jnp.zeros((Hp, 1, TC), pad_ref.dtype)
    pad_ref[0:1, :, :] = zrow
    pad_ref[H + 1:H + 2, :, :] = zrow
    pad_ref[:, 0:1, :] = zcol
    pad_ref[:, W + 1:W + 2, :] = zcol
    pad_ref[1:H + 1, 1:W + 1, :] = x_ref[0]

    w = w_ref[...]
    acc = None
    for kh in range(3):
        for kw in range(3):
            t = pad_ref[kh:kh + H, kw:kw + W, :].astype(jnp.float32) * w[kh, kw, :]
            acc = t if acc is None else acc + t
    y = acc + shift_ref[0]
    if relu:
        y = jnp.maximum(y, 0.0)
    o_ref[0] = y.astype(o_ref.dtype)


def _dw3x3_s2_kernel(*refs, n_in, taps, relu):
    # 3x3 depthwise, stride 2, pad=1, via even/odd phase decomposition of the
    # padded input (4 phase arrays); every tap is a contiguous (Ho, Wo) slice.
    x_refs = refs[:n_in]
    w_ref, shift_ref, o_ref = refs[n_in], refs[n_in + 1], refs[n_in + 2]
    Ho, Wo = o_ref.shape[1], o_ref.shape[2]
    w = w_ref[...]
    acc = None
    for ri, a, b, kh, kw in taps:
        t = x_refs[ri][0, a:a + Ho, b:b + Wo, :].astype(jnp.float32) * w[kh, kw, :]
        acc = t if acc is None else acc + t
    y = acc + shift_ref[0]
    if relu:
        y = jnp.maximum(y, 0.0)
    o_ref[0] = y.astype(o_ref.dtype)


# ---------------- wrappers around pallas_call ----------------

def _choose_tm(M, cin, cout, has_res):
    """Row tile: <=512, >=2 grid steps when possible, VMEM-budget aware."""
    tm = min(512, max(8, _round_up((M + 1) // 2, 8)))
    budget = _vmem_limit_bytes() // 2

    def step_bytes(t):
        b = 2 * t * (2 * cin + 4 * cout)            # dbl-buffered x (bf16) + out (f32)
        if has_res:
            b += 2 * t * 2 * cout                   # dbl-buffered residual (bf16)
        b += 2 * (2 * cin * cout + 4 * cout)        # weights (bf16) + shift (f32)
        return b

    while tm > 8 and step_bytes(tm) > budget:
        tm = max(8, _round_up(tm // 2, 8))
    return tm, _round_up(M, tm)


def conv1x1_bn(x_nhwc, w_bf16, shift_f32, *, relu, residual=None,
               out_dtype=jnp.bfloat16):
    """1x1 conv as one matmul + fused BN shift (+residual) (+ReLU).

    Channel dims are assumed pre-padded to lane multiples (lane-dense stores).
    """
    B, H, W, Cin = x_nhwc.shape
    Cout = w_bf16.shape[1]
    M = B * H * W
    TM, Mp = _choose_tm(M, Cin, Cout, residual is not None)

    x2d = x_nhwc.reshape(M, Cin)
    if Mp != M:
        x2d = jnp.pad(x2d, ((0, Mp - M), (0, 0)))

    in_specs = [pl.BlockSpec((TM, Cin), lambda i: (i, 0)),
                pl.BlockSpec((Cin, Cout), lambda i: (0, 0)),
                pl.BlockSpec((1, Cout), lambda i: (0, 0))]
    args = [x2d, w_bf16, shift_f32.reshape(1, Cout)]
    if residual is not None:
        r2d = residual.reshape(M, Cout)
        if Mp != M:
            r2d = jnp.pad(r2d, ((0, Mp - M), (0, 0)))
        in_specs.append(pl.BlockSpec((TM, Cout), lambda i: (i, 0)))
        args.append(r2d)
        kern = functools.partial(_matmul_bn_res_kernel, relu=relu)
    else:
        kern = functools.partial(_matmul_bn_kernel, relu=relu)

    out2d = pl.pallas_call(
        kern,
        out_shape=jax.ShapeDtypeStruct((Mp, Cout), out_dtype),
        grid_spec=pltpu.PrefetchScalarGridSpec(
            num_scalar_prefetch=0,
            grid=(Mp // TM,),
            in_specs=in_specs,
            out_specs=pl.BlockSpec((TM, Cout), lambda i: (i, 0))),
        compiler_params=pltpu.CompilerParams(
            dimension_semantics=("parallel",),
            vmem_limit_bytes=_vmem_limit_bytes()),
    )(*args)
    if Mp != M:
        out2d = out2d[:M]
    return out2d.reshape(B, H, W, Cout)


def depthwise3x3_bn(x_nhwc, w33c, scale, shift, *, stride, relu,
                    out_dtype=jnp.bfloat16):
    """3x3 depthwise conv (pad=1, stride 1 or 2) + fused BN (+ReLU)."""
    B, H, W, C = x_nhwc.shape
    w_f = (w33c * scale[None, None, :]).astype(jnp.float32)
    shift3d = shift.reshape(1, 1, C).astype(jnp.float32)
    TC = LANE if C % LANE == 0 else C
    nC = C // TC
    grid = (B, nC)

    if stride == 1:
        Ho, Wo = H, W
        kern = functools.partial(_dw3x3_s1_kernel, relu=relu)
        in_specs = [pl.BlockSpec((1, H, W, TC), lambda b, c: (b, 0, 0, c)),
                    pl.BlockSpec((3, 3, TC), lambda b, c: (0, 0, c)),
                    pl.BlockSpec((1, 1, TC), lambda b, c: (0, 0, c))]
        args = [x_nhwc, w_f, shift3d]
        scratch = [pltpu.VMEM((H + 2, W + 2, TC), x_nhwc.dtype)]
    else:
        Ho = (H - 1) // 2 + 1
        Wo = (W - 1) // 2 + 1
        # Pad one extra trailing row/col so all 4 phases have uniform shape.
        xp = jnp.pad(x_nhwc, ((0, 0), (1, 2), (1, 2), (0, 0)))
        phases = [xp[:, p:p + 2 * Ho + 1:2, q:q + 2 * Wo + 1:2, :]
                  for p in range(2) for q in range(2)]
        taps = tuple((2 * (kh % 2) + (kw % 2), kh // 2, kw // 2, kh, kw)
                     for kh in range(3) for kw in range(3))
        Hin, Win = Ho + 1, Wo + 1
        kern = functools.partial(_dw3x3_s2_kernel, n_in=4, taps=taps, relu=relu)
        in_specs = ([pl.BlockSpec((1, Hin, Win, TC), lambda b, c: (b, 0, 0, c))] * 4
                    + [pl.BlockSpec((3, 3, TC), lambda b, c: (0, 0, c)),
                       pl.BlockSpec((1, 1, TC), lambda b, c: (0, 0, c))])
        args = phases + [w_f, shift3d]
        scratch = []

    out = pl.pallas_call(
        kern,
        out_shape=jax.ShapeDtypeStruct((B, Ho, Wo, C), out_dtype),
        grid_spec=pltpu.PrefetchScalarGridSpec(
            num_scalar_prefetch=0,
            grid=grid,
            in_specs=in_specs,
            out_specs=pl.BlockSpec((1, Ho, Wo, TC), lambda b, c: (b, 0, 0, c)),
            scratch_shapes=scratch),
        compiler_params=pltpu.CompilerParams(
            dimension_semantics=("parallel", "parallel"),
            vmem_limit_bytes=_vmem_limit_bytes()),
    )(*args)
    return out


# ---------------- parameter setup (deterministic, synthetic) ----------------

def init_bottleneck_params(key, in_channels, out_channels, stride, num_groups):
    assert stride in (1, 2)
    mid = out_channels // 4
    out_eff = out_channels - in_channels if stride == 2 else out_channels
    ks = jax.random.split(key, 15)

    def bn(k1, k2, k3, k4, c):
        return dict(gamma=jax.random.uniform(k1, (c,), minval=0.5, maxval=1.5),
                    beta=0.1 * jax.random.normal(k2, (c,)),
                    mean=0.1 * jax.random.normal(k3, (c,)),
                    var=jax.random.uniform(k4, (c,), minval=0.5, maxval=1.5))

    return dict(
        w1=0.2 * jax.random.normal(ks[0], (mid, in_channels // num_groups, 1, 1)),
        bn1=bn(ks[1], ks[2], ks[3], ks[4], mid),
        w2=0.2 * jax.random.normal(ks[5], (mid, 1, 3, 3)),
        bn2=bn(ks[6], ks[7], ks[8], ks[9], mid),
        w3=0.2 * jax.random.normal(ks[10], (out_eff, mid // num_groups, 1, 1)),
        bn3=bn(ks[11], ks[12], ks[13], ks[14], out_eff),
    )


def _fuse_bn(bn):
    scale = bn['gamma'] / jnp.sqrt(bn['var'] + EPS)
    shift = bn['beta'] - bn['mean'] * scale
    return scale.astype(jnp.float32), shift.astype(jnp.float32)


def _block_diag(w, groups):
    # grouped 1x1 conv weight (Cout, Cin/g, 1, 1) -> dense block-diag (Cin, Cout)
    cout, cinpg = w.shape[0], w.shape[1]
    coutpg = cout // groups
    cin = cinpg * groups
    W = jnp.zeros((cin, cout), jnp.float32)
    for gi in range(groups):
        blk = w[gi * coutpg:(gi + 1) * coutpg, :, 0, 0]  # (coutpg, cinpg)
        W = W.at[gi * cinpg:(gi + 1) * cinpg,
                 gi * coutpg:(gi + 1) * coutpg].set(blk.T)
    return W


# ---------------- Bottleneck forward (Pallas path) ----------------

def bottleneck_forward(params, x_nchw, *, in_channels, out_channels, stride,
                       num_groups):
    g = num_groups
    mid = out_channels // 4
    out_eff = out_channels - in_channels if stride == 2 else out_channels
    cin_p = _round_up(in_channels, LANE)
    mid_p = _round_up(mid, LANE)
    out_p = _round_up(out_eff, LANE)

    # NCHW -> NHWC, bf16, channels zero-padded to a lane multiple (one fused
    # XLA pass at the boundary); padded channels stay exactly 0 end-to-end.
    x = jnp.transpose(x_nchw, (0, 2, 3, 1)).astype(jnp.bfloat16)
    x = jnp.pad(x, ((0, 0), (0, 0), (0, 0), (0, cin_p - in_channels)))

    # conv1 (grouped 1x1) + bn1 + relu; channel shuffle folded into weights.
    s1, b1 = _fuse_bn(params['bn1'])
    w1 = _block_diag(params['w1'], g)                           # (Cin, mid)
    perm = jnp.arange(mid).reshape(g, mid // g).T.reshape(-1)
    w1 = w1[:, perm] * s1[perm][None, :]
    w1 = jnp.pad(w1, ((0, cin_p - in_channels),
                      (0, mid_p - mid))).astype(jnp.bfloat16)
    sh1 = jnp.pad(b1[perm], (0, mid_p - mid)).astype(jnp.float32)
    out = conv1x1_bn(x, w1, sh1, relu=True, out_dtype=jnp.bfloat16)

    # conv2: 3x3 depthwise (stride, pad=1) + bn2 (no relu).
    w2 = jnp.transpose(params['w2'][:, 0, :, :], (1, 2, 0))     # (3,3,mid)
    w2 = jnp.pad(w2, ((0, 0), (0, 0), (0, mid_p - mid)))
    s2, b2 = _fuse_bn(params['bn2'])
    s2 = jnp.pad(s2, (0, mid_p - mid), constant_values=1.0)
    b2 = jnp.pad(b2, (0, mid_p - mid))
    out = depthwise3x3_bn(out, w2, s2, b2, stride=stride, relu=False,
                          out_dtype=jnp.bfloat16)

    # conv3 (grouped 1x1) + bn3 with fused residual / final ReLU epilogue.
    s3, b3 = _fuse_bn(params['bn3'])
    w3 = _block_diag(params['w3'], g) * s3[None, :]             # (mid, out_eff)
    w3 = jnp.pad(w3, ((0, mid_p - mid),
                      (0, out_p - out_eff))).astype(jnp.bfloat16)
    sh3 = jnp.pad(b3, (0, out_p - out_eff)).astype(jnp.float32)

    if stride == 1:
        assert in_channels == out_channels
        out = conv1x1_bn(out, w3, sh3, relu=True, residual=x,
                         out_dtype=jnp.float32)
        out = out[..., :out_channels]
    else:
        out = conv1x1_bn(out, w3, sh3, relu=True, out_dtype=jnp.float32)
        # Shortcut: AvgPool2d(3, stride=2, pad=1), count_include_pad => /9,
        # with the final ReLU fused (relu distributes over the channel concat).
        avg_w = jnp.full((3, 3, cin_p), 1.0 / 9.0, jnp.float32)
        res = depthwise3x3_bn(x, avg_w, jnp.ones((cin_p,), jnp.float32),
                              jnp.zeros((cin_p,), jnp.float32), stride=2,
                              relu=True, out_dtype=jnp.float32)
        out = jnp.concatenate([res[..., :in_channels], out[..., :out_eff]],
                              axis=-1)

    return jnp.transpose(out, (0, 3, 1, 2)).astype(jnp.float32)  # NHWC -> NCHW


# ---------------- pure-JAX reference (for verification) ----------------

def bottleneck_reference(params, x, *, in_channels, out_channels, stride,
                         num_groups):
    g = num_groups
    mid = out_channels // 4
    dn = ('NCHW', 'OIHW', 'NCHW')

    def bn_apply(y, bn):
        sh = (1, -1, 1, 1)
        return ((y - bn['mean'].reshape(sh))
                / jnp.sqrt(bn['var'].reshape(sh) + EPS)
                * bn['gamma'].reshape(sh) + bn['beta'].reshape(sh))

    out = lax.conv_general_dilated(x, params['w1'], (1, 1), 'VALID',
                                   feature_group_count=g, dimension_numbers=dn)
    out = jax.nn.relu(bn_apply(out, params['bn1']))
    b, c, h, w = out.shape
    n = c // g
    out = out.reshape(b, g, n, h, w).transpose(0, 2, 1, 3, 4).reshape(b, c, h, w)
    out = lax.conv_general_dilated(out, params['w2'], (stride, stride),
                                   ((1, 1), (1, 1)), feature_group_count=mid,
                                   dimension_numbers=dn)
    out = bn_apply(out, params['bn2'])
    out = lax.conv_general_dilated(out, params['w3'], (1, 1), 'VALID',
                                   feature_group_count=g, dimension_numbers=dn)
    out = bn_apply(out, params['bn3'])
    if stride == 2:
        res = lax.reduce_window(x, 0.0, lax.add, (1, 1, 3, 3), (1, 1, 2, 2),
                                ((0, 0), (0, 0), (1, 1), (1, 1))) / 9.0
        out = jax.nn.relu(jnp.concatenate([res, out], axis=1))
    else:
        out = jax.nn.relu(x + out)
    return out


if __name__ == "__main__":
    key = jax.random.PRNGKey(0)
    configs = [
        dict(B=2, Cin=16, H=8, W=8, Cout=16, stride=1, groups=2),  # residual path
        dict(B=2, Cin=16, H=8, W=8, Cout=32, stride=2, groups=2),  # avgpool/concat path
    ]
    for cfg in configs:
        key, kx, kp = jax.random.split(key, 3)
        x = jax.random.normal(kx, (cfg['B'], cfg['Cin'], cfg['H'], cfg['W']),
                              jnp.float32)
        params = init_bottleneck_params(kp, cfg['Cin'], cfg['Cout'],
                                        cfg['stride'], cfg['groups'])
        y = bottleneck_forward(params, x, in_channels=cfg['Cin'],
                               out_channels=cfg['Cout'], stride=cfg['stride'],
                               num_groups=cfg['groups'])
        y = jax.block_until_ready(y)
        y_ref = bottleneck_reference(params, x, in_channels=cfg['Cin'],
                                     out_channels=cfg['Cout'],
                                     stride=cfg['stride'],
                                     num_groups=cfg['groups'])
        assert y.shape == y_ref.shape, (y.shape, y_ref.shape)
        err = float(jnp.max(jnp.abs(y - y_ref)))
        # bf16 operands / bf16 intermediate activations => looser tolerance.
        tol = 1e-2 + 2e-2 * float(jnp.max(jnp.abs(y_ref)))
        assert err < tol, (err, tol)
    print("KERNEL_OK")
</pallas_src>

<mosaic_0001>
module attributes {stable_mosaic.version = 11 : i64} {
  func.func @_matmul_bn_kernel(%arg0: i32, %arg1: memref<64x128xbf16, #tpu.memory_space<vmem>>, %arg2: memref<128x128xbf16, #tpu.memory_space<vmem>>, %arg3: memref<1x128xf32, #tpu.memory_space<vmem>>, %arg4: memref<64x128xbf16, #tpu.memory_space<vmem>>) attributes {dimension_semantics = [#tpu.dimension_semantics<parallel>], iteration_bounds = array<i64: 2>, scalar_prefetch = 0 : i64, scratch_operands = 0 : i64, tpu.core_type = #tpu.core_type<tc>, window_params = [{transform_indices = @transform_0, window_bounds = array<i64: 64, 128>}, {pipeline_mode = #tpu.pipeline_mode<synchronous>, transform_indices = @transform_1, window_bounds = array<i64: 128, 128>}, {pipeline_mode = #tpu.pipeline_mode<synchronous>, transform_indices = @transform_2, window_bounds = array<i64: 1, 128>}, {transform_indices = @transform_3, window_bounds = array<i64: 64, 128>}]} {
    %c0 = arith.constant 0 : index
    %c0_0 = arith.constant 0 : index
    %0 = vector.load %arg1[%c0, %c0_0] : memref<64x128xbf16, #tpu.memory_space<vmem>>, vector<64x128xbf16>
    %c0_1 = arith.constant 0 : index
    %c0_2 = arith.constant 0 : index
    %1 = vector.load %arg2[%c0_1, %c0_2] : memref<128x128xbf16, #tpu.memory_space<vmem>>, vector<128x128xbf16>
    %cst = arith.constant dense<0.000000e+00> : vector<64x128xf32>
    %2 = tpu.matmul %0, %1, %cst {dimension_numbers = #tpu.dot_dimension_numbers<[1], [0], [0], [1], [0, 0, 1, 1], [], []>} : vector<64x128xbf16>, vector<128x128xbf16>, vector<64x128xf32> -> vector<64x128xf32>
    %c0_3 = arith.constant 0 : index
    %c0_4 = arith.constant 0 : index
    %3 = vector.load %arg3[%c0_3, %c0_4] : memref<1x128xf32, #tpu.memory_space<vmem>>, vector<1x128xf32>
    %4 = vector.broadcast %3 : vector<1x128xf32> to vector<64x128xf32>
    %5 = arith.addf %2, %4 : vector<64x128xf32>
    %cst_5 = arith.constant 0.000000e+00 : f32
    %6 = vector.broadcast %cst_5 : f32 to vector<64x128xf32>
    %7 = arith.maximumf %5, %6 : vector<64x128xf32>
    %8 = arith.truncf %7 : vector<64x128xf32> to vector<64x128xbf16>
    %c0_6 = arith.constant 0 : index
    %c0_7 = arith.constant 0 : index
    %9 = vector.load %arg4[%c0_6, %c0_7] : memref<64x128xbf16, #tpu.memory_space<vmem>>, vector<64x128xbf16>
    tpu.vector_store %arg4[%c0_6, %c0_7], %8 {strides = array<i32>} : memref<64x128xbf16, #tpu.memory_space<vmem>>, vector<64x128xbf16>,
    return
  }
  func.func @transform_0(%arg0: i32) -> (i32, i32) {
    %c0_i32 = arith.constant 0 : i32
    %c0_i32_0 = arith.constant 0 : i32
    return %arg0, %c0_i32 : i32, i32
  }
  func.func @transform_1(%arg0: i32) -> (i32, i32) {
    %c0_i32 = arith.constant 0 : i32
    %c0_i32_0 = arith.constant 0 : i32
    %c0_i32_1 = arith.constant 0 : i32
    return %c0_i32, %c0_i32_0 : i32, i32
  }
  func.func @transform_2(%arg0: i32) -> (i32, i32) {
    %c0_i32 = arith.constant 0 : i32
    %c0_i32_0 = arith.constant 0 : i32
    %c0_i32_1 = arith.constant 0 : i32
    return %c0_i32, %c0_i32_0 : i32, i32
  }
  func.func @transform_3(%arg0: i32) -> (i32, i32) {
    %c0_i32 = arith.constant 0 : i32
    %c0_i32_0 = arith.constant 0 : i32
    return %arg0, %c0_i32 : i32, i32
  }
}

</mosaic_0001>

<bundles_post_ra>
// kernel: tpu_custom_call.1
= control target key start
LH: loop header
LB: loop body
LE: loop exit
PB: predicated region body
PF: predicated region fallthrough
CT: control target
= control target key end

     0   :  { %8 = vsyncpa [#allocation3], 0  ;;  %s1062_s0 = inlined_call_operand.hbm [shape: bf16[128,128], index: 0, kind: input, shape index: {}]   ;;  %s1063_s1 = inlined_call_operand.hbm [shape: bf16[128,128], index: 1, kind: input, shape index: {}]   ;;  %s1064_s2 = inlined_call_operand.vmem [shape: f32[1,128], index: 2, kind: input, shape index: {}]   ;;  %s1065_s3 = inlined_call_operand.hbm [shape: bf16[128,128], index: 3, kind: output, shape index: {}]  }
   0x1   :  { %10 = vsyncpa [#allocation3 + $0x1], 0 }
   0x2   :  { %11 = vsyncpa [#allocation6], 0 }
   0x3   :  { %12 = vsyncpa [#allocation4], 0 }
   0x4   :  { %14 = vsyncpa [#allocation4 + $0x1], 0  ;;  %s866_s12 = smov 0   ;;  %s868_s13 = smov 0  }
   0x5   :  { %s870_s14 = smov 0   ;;  %s872_s15 = smov 0  }
   0x6 LB: > { %s887_s16 = sadd.s32 4294967295, %s837_s15   ;;  %s520_s17 = sadd.s32 4294967294, %s837_s15   ;;  %s837_s15 = sphi %s872_s15, %s1087_s15   ;;  %s833_s14 = sphi %s870_s14, %s1086_s14   ;;  %s829_s13 = sphi %s868_s13, %s1085_s13   ;;  %s825_s12 = sphi %s866_s12, %s1084_s12  }
   0x7   : > { %p40_p0 = scmp.ne.s32.totalorder %s829_s13, %s825_s12  ;;  %p1066_p1 = scmp.eq.s32.totalorder %s887_s16, 0 }
   0x8   : > { %p112_p3 = scmp.eq.s32.totalorder %s520_s17, 1  ;;  %p521_p5 = scmp.ge.s32.totalorder %s837_s15, 1 }
   0x9   : > { %p896_p4 = por %p1066_p1, %p40_p0  ;;  %p119_p7 = scmp.lt.s32.totalorder %s837_s15, 3 }
   0xa   : > { %p901_p6 = por %p112_p3, %p40_p0  ;;  %s839_s21 = smov [#allocation5]  }
   0xb   : > { %s1070_s18 = scalar_select %p896_p4, 1, 0 }
   0xc   : > { %s1071_s19 = scalar_select %p901_p6, 1, 0 }
   0xd   : > { %p906_p8 = pnand %p521_p5, %p119_p7  ;;  %s131_s22 = sshll.u32 %s839_s21, 4  ;;  %s132_s22 = int_to_ptr.vmem [resolvable:$true] %s131_s22 }
   0xe   : > { %s920_s24 = sadd.s32 1, %s837_s15   ;;  %s27_s25 = sadd.s32 1, %s833_s14 }
   0xf   : > { %s1072_s20 = scalar_select %p906_p8, 1, 0 }
  0x10   : > { %p650_p9 = pneg %p906_p8  ;;  %s24_s26 = ssub.s32 %s837_s15, %s920_s24 }
  0x11   : > { %s726_s27 = scalar_lea.vmem %s132_s22, 1024  ;;  %p734_p5 = scmp.lt.s32.totalorder %s132_s22, %s132_s22 }
  0x12   : > { %p915_p11 = pnand %p650_p9, %p1066_p1  ;;  %p727_p13 = scmp.ne.s32.totalorder %s132_s22, %s726_s27 }
  0x13   : > { %p735_p7 = scmp.lt.s32.totalorder %s726_s27, %s726_s27 }
  0x14   : > { %p717_p12 = pneg %p915_p11 }
  0x15   : > { %p736_p10 = por %p735_p7, %p734_p5 }
  0x16   : > { %p729_p0 = pnand %p727_p13, %p717_p12 }
  0x18   : > { %p730_p3 = pneg %p729_p0 }
  0x1a   : > { %p737_p2 = pnand %p736_p10, %p730_p3 }
  0x1c   : > { %740 = shalt.err (!%p737_p2)
}
  0x1d   : > { %s840_s28 = smov 64   ;;  %s841_s29 = smov 4  }
  0x1e   : > { %653 = dma.hbm_to_vmem [thread:$0]  (!%p915_p11), %s1063_s1, 1024, %s132_s22, [#allocation6], %s840_s28, %s840_s28, %s841_s29  }
  0x1f   : > { %p25_p2 = scmp.eq.s32.totalorder %s24_s26, 0  ;;  %p34_p9 = scmp.ne.s32.totalorder %s833_s14, %s829_s13 }
  0x20   : > { %p35_p10 = scmp.eq.s32.totalorder %s837_s15, 0  ;;  %p663_p12 = scmp.lt.s32.totalorder %s837_s15, 2 }
  0x21   : > { %s940_s5 = scalar_select %p25_p2, %s833_s14, %s27_s25  }
  0x22   : > { %p36_p13 = por %p35_p10, %p34_p9  ;;  %p1074_p0 = scmp.eq.s32.totalorder %s887_s16, 1 }
  0x23   : > { %s148_s7 = sand.u32 1, %s833_s14   ;;  %s557_s8 = sshll.u32 %s837_s15, 9 }
  0x24   : > { %p944_p3 = por %p1074_p0, %p34_p9  ;;  %s524_s9 = sshll.u32 %s148_s7, 5 }
  0x25   : > { %s953_s17 = scalar_lea.hbm %s1062_s0, %s557_s8  ;;  %s152_s21 = scalar_lea.vmem [#allocation2], %s524_s9 }
  0x26   : > { %s1075_s6 = scalar_select %p944_p3, 1, 0 }
  0x27   : > { %s159_s22 = sshll.u32 %s152_s21, 4  ;;  %p955_p11 = pnand %p663_p12, %p36_p13  ;;  %s959_s22 = int_to_ptr.vmem [resolvable:$true] %s159_s22 }
  0x28   : > { %s961_s25 = scalar_lea.sflag [#allocation3], %s148_s7  ;;  %s741_s26 = scalar_lea.hbm %s953_s17, 512 }
  0x29   : > { %p742_p5 = scmp.ne.s32.totalorder %s953_s17, %s741_s26  ;;  %p743_p7 = pneg %p955_p11 }
  0x2a   : > { %s746_s4 = scalar_lea.hbm %s1062_s0, 1024  ;;  %p747_p10 = scmp.lt.s32.totalorder %s953_s17, %s1062_s0 }
  0x2b   : > { %p744_p2 = pnand %p743_p7, %p742_p5  ;;  %p748_p12 = scmp.lt.s32.totalorder %s746_s4, %s741_s26 }
  0x2d   : > { %p745_p9 = pneg %p744_p2  ;;  %p749_p13 = por %p748_p12, %p747_p10 }
  0x2f   : > { %p750_p0 = pnand %p749_p13, %p745_p9 }
  0x31   : > { %753 = shalt.err (!%p750_p0)
}
  0x32   : > { %s754_s7 = scalar_lea.vmem %s959_s22, 512  ;;  %s842_s10 = smov [#allocation2]  }
  0x33   : > { %p755_p1 = scmp.ne.s32.totalorder %s959_s22, %s754_s7  ;;  %s759_s11 = sshll.u32 %s842_s10, 4  ;;  %s760_s11 = int_to_ptr.vmem [resolvable:$false] %s759_s11 }
  0x34   : > { %s761_s21 = scalar_lea.vmem %s760_s11, 1024  ;;  %p762_p2 = scmp.lt.s32.totalorder %s959_s22, %s760_s11 }
  0x35   : > { %p757_p6 = pnand %p755_p1, %p743_p7  ;;  %p763_p3 = scmp.lt.s32.totalorder %s761_s21, %s754_s7 }
  0x37   : > { %p758_p5 = pneg %p757_p6  ;;  %p764_p4 = por %p763_p3, %p762_p2 }
  0x39   : > { %p765_p8 = pnand %p764_p4, %p758_p5 }
  0x3b   : > { %768 = shalt.err (!%p765_p8)
}
  0x3c   : > { %657 = dma.hbm_to_vmem [thread:$0]  (!%p955_p11), %s953_s17, 512, %s959_s22, %s961_s25, %s840_s28, %s840_s28, %s841_s29  }
  0x3d   : > { %p1077_p1 = scmp.ne.s32.totalorder %s1072_s20, 0 }
  0x3e   : > { %s988_s26 = sand.u32 (!%p1077_p1), 1, %s829_s13   ;;  %p1078_p4 = scmp.ne.s32.totalorder (!%p1077_p1), %s1070_s18, 0 }
  0x3f   : > { %171 = sbr.rel (%p1077_p1) target bundleno = 324 (0x144), region = 32  ;;  %s528_s27 = sshll.u32 (!%p1077_p1), %s988_s26, 5 }
  0x40   : > { %s174_s30 = scalar_lea.sflag (!%p1077_p1), [#allocation3], %s988_s26  ;;  %s994_s23 = scalar_lea.vmem (!%p1077_p1), [#allocation2], %s528_s27 }
  0x44   : > { %812 = dma.done.wait (%p1078_p4), %s174_s30, 512  }
  0x45   : > { %814 = vsyncadd (%p1078_p4), %s174_s30, 4294966784  ;;  %p1079_p6 = scmp.eq.s32.totalorder %s887_s16, 0 }
  0x47   : > { %816 = dma.done.wait (%p1079_p6), [#allocation6], 1024   ;;  %p1080_p8 = pmov %p1079_p6 }
  0x48   : > { %v703_v0 = vld [vmem:[#allocation5 + $0x38] sm:$0xff]   ;;  %v704_v1 = vld [vmem:[#allocation5 + $0x30] sm:$0xff]   ;;  %v705_v2 = vld [vmem:[#allocation5 + $0x28] sm:$0xff]   ;;  %s203_s28 = scalar_lea.vmem [#allocation7], %s528_s27  ;;  %s566_s17 = sshll.u32 %s887_s16, 9 }
  0x49   : > { %818 = vsyncadd (%p1080_p8), [#allocation6], 4294966272  ;;  %602 = vmatprep.subr.bf16.mxu0 %v703_v0  ;;  %626 = vmatprep.subr.bf16.mxu1 %v703_v0  ;;  %v706_v3 = vld [vmem:[#allocation5 + $0x20] sm:$0xff]   ;;  %v712_v5 = vld [vmem:[%s994_s23 + $0x10] sm:$0xff]   ;;  %s437_s29 = sshll.u32 %s203_s28, 4  ;;  %s1019_s4 = scalar_lea.hbm %s1065_s3, %s566_s17  ;;  %s1014_s29 = int_to_ptr.vmem [resolvable:$true] %s437_s29 }
  0x4a   : > { %603 = vmatpush3.bf16.msra.mxu0 %v703_v0  ;;  %634 = vmatpush3.bf16.msra.mxu1 %v703_v0  ;;  %v711_v4 = vld [vmem:[%s994_s23] sm:$0xff]   ;;  %v707_v6 = vld [vmem:[#allocation5 + $0x18] sm:$0xff]   ;;  %v708_v7 = vld [vmem:[#allocation5 + $0x10] sm:$0xff]   ;;  %s424_s16 = scalar_lea.sflag [#allocation4], %s988_s26  ;;  %s769_s8 = scalar_lea.vmem %s1014_s29, 512 }
  0x4b   : > { %604 = vmatprep.subr.bf16.mxu0 %v704_v1  ;;  %627 = vmatprep.subr.bf16.mxu1 %v704_v1  ;;  %v709_v8 = vld [vmem:[#allocation5 + $0x8] sm:$0xff]   ;;  %v710_v9 = vld [vmem:[#allocation5] sm:$0xff]   ;;  %v714_v11 = vld [vmem:[%s994_s23 + $0x18] sm:$0xff]   ;;  %p770_p3 = scmp.ne.s32.totalorder %s1014_s29, %s769_s8  ;;  %p1081_p11 = scmp.ne.s32.totalorder %s1075_s6, 0 }
  0x4c   : > { %618 = vmatprep.mubr.bf16.mxu0 %v711_v4  ;;  %622 = vmatprep.mubr.bf16.mxu1 %v712_v5  ;;  %v713_v10 = vld [vmem:[%s994_s23 + $0x8] sm:$0xff]   ;;  %v531_v12 = vld [vmem:[%s1064_s2] ss:$0 sm:$0xff]  ;;  %s843_s9 = smov [#allocation7]  }
  0x4d   : > { %p771_p7 = pnand %p770_p3, %p1081_p11  ;;  %s773_s7 = sshll.u32 %s843_s9, 4  ;;  %s774_s7 = int_to_ptr.vmem [resolvable:$false] %s773_s7 }
  0x4e   : > { %605 = vmatpush3.bf16.msra.mxu0 %v704_v1  ;;  %635 = vmatpush3.bf16.msra.mxu1 %v704_v1  ;;  %s775_s10 = scalar_lea.vmem %s774_s7, 1024  ;;  %p776_p10 = scmp.lt.s32.totalorder %s1014_s29, %s774_s7 }
  0x4f   : > { %606 = vmatprep.subr.bf16.mxu0 %v705_v2  ;;  %628 = vmatprep.subr.bf16.mxu1 %v705_v2  ;;  %p772_p9 = pneg %p771_p7  ;;  %p777_p12 = scmp.lt.s32.totalorder %s775_s10, %s769_s8 }
  0x51   : > { %p778_p13 = por %p777_p12, %p776_p10 }
  0x52   : > { %607 = vmatpush3.bf16.msra.mxu0 %v705_v2  ;;  %636 = vmatpush3.bf16.msra.mxu1 %v705_v2 }
  0x53   : > { %608 = vmatprep.subr.bf16.mxu0 %v706_v3  ;;  %629 = vmatprep.subr.bf16.mxu1 %v706_v3  ;;  %p779_p0 = pnand %p778_p13, %p772_p9 }
  0x56   : > { %609 = vmatpush3.bf16.msra.mxu0 %v706_v3  ;;  %637 = vmatpush3.bf16.msra.mxu1 %v706_v3 }
  0x57   : > { %610 = vmatprep.subr.bf16.mxu0 %v707_v6  ;;  %630 = vmatprep.subr.bf16.mxu1 %v707_v6 }
  0x5a   : > { %611 = vmatpush3.bf16.msra.mxu0 %v707_v6  ;;  %638 = vmatpush3.bf16.msra.mxu1 %v707_v6 }
  0x5b   : > { %612 = vmatprep.subr.bf16.mxu0 %v708_v7  ;;  %631 = vmatprep.subr.bf16.mxu1 %v708_v7 }
  0x5e   : > { %613 = vmatpush3.bf16.msra.mxu0 %v708_v7  ;;  %639 = vmatpush3.bf16.msra.mxu1 %v708_v7 }
  0x5f   : > { %614 = vmatprep.subr.bf16.mxu0 %v709_v8  ;;  %632 = vmatprep.subr.bf16.mxu1 %v709_v8 }
  0x62   : > { %615 = vmatpush3.bf16.msra.mxu0 %v709_v8  ;;  %640 = vmatpush3.bf16.msra.mxu1 %v709_v8 }
  0x63   : > { %616 = vmatprep.subr.bf16.mxu0 %v710_v9  ;;  %633 = vmatprep.subr.bf16.mxu1 %v710_v9 }
  0x66   : > { %617 = vmatpush3.bf16.msra.mxu0 %v710_v9  ;;  %641 = vmatpush3.bf16.msra.mxu1 %v710_v9 }
  0x69   : > { %619 = vmatmul.mubr.bf16.vlgmr.msra.gmra.mxu0 %v713_v10  ;;  %623 = vmatmul.mubr.bf16.vlgmr.msra.gmra.mxu1 %v714_v11 }
 0x129   : > { %v620_v13 = vpop.f32.mrf.mxu0  ;;  %v624_v14 = vpop.f32.mrf.mxu1 }
 0x12a   : > { %v353_v15 = vadd.f32 %v620_v13, %v531_v12  ;;  %v369_v16 = vadd.f32 %v624_v14, %v531_v12 }
 0x12b   : > { %v344_v17 = vpop.f32.mrf.mxu0  ;;  %v360_v18 = vpop.f32.mrf.mxu1 }
 0x12c   : > { %v345_v19 = vadd.f32 %v531_v12, %v344_v17  ;;  %v361_v20 = vadd.f32 %v531_v12, %v360_v18  ;;  %v377_v25 = vmax.f32 %v353_v15, 0.0  ;;  %v381_v26 = vmax.f32 %v369_v16, 0.0 }
 0x12d   : > { %v621_v21 = vpop.f32.mrf.mxu0  ;;  %v625_v22 = vpop.f32.mrf.mxu1 }
 0x12e   : > { %v356_v23 = vadd.f32 %v621_v21, %v531_v12  ;;  %v372_v24 = vadd.f32 %v625_v22, %v531_v12  ;;  %v375_v33 = vmax.f32 %v345_v19, 0.0  ;;  %v379_v34 = vmax.f32 %v361_v20, 0.0 }
 0x12f   : > { %v347_v27 = vpop.f32.mrf.mxu0  ;;  %v363_v28 = vpop.f32.mrf.mxu1 }
 0x130   : > { %v378_v29 = vmax.f32 %v356_v23, 0.0  ;;  %v382_v30 = vmax.f32 %v372_v24, 0.0  ;;  %v348_v31 = vadd.f32 %v531_v12, %v347_v27  ;;  %v364_v32 = vadd.f32 %v531_v12, %v363_v28 }
 0x132   : > { %v575_v35 = vpack.c.bf16 %v378_v29, %v377_v25  ;;  %v585_v36 = vpack.c.bf16 %v382_v30, %v381_v26  ;;  %v376_v37 = vmax.f32 %v348_v31, 0.0  ;;  %v380_v38 = vmax.f32 %v364_v32, 0.0 }
 0x134   : > { %587 = vst [vmem:[%s203_s28 + $0x8] sm:$0xff] %v575_v35   ;;  %589 = vst [vmem:[%s203_s28 + $0x18] sm:$0xff] %v585_v36   ;;  %v570_v39 = vpack.c.bf16 %v376_v37, %v375_v33  ;;  %v580_v40 = vpack.c.bf16 %v380_v38, %v379_v34 }
 0x136   : > { %571 = vst [vmem:[%s203_s28] sm:$0xff] %v570_v39   ;;  %588 = vst [vmem:[%s203_s28 + $0x10] sm:$0xff] %v580_v40  }
 0x137   : > { %782 = shalt.err (!%p779_p0)
}
 0x138   : > { %s783_s11 = scalar_lea.hbm %s1019_s4, 512  ;;  %s787_s30 = scalar_lea.hbm %s1065_s3, 1024 }
 0x139   : > { %p784_p5 = scmp.ne.s32.totalorder %s1019_s4, %s783_s11  ;;  %p788_p4 = scmp.lt.s32.totalorder %s1019_s4, %s1065_s3 }
 0x13a   : > { %p789_p6 = scmp.lt.s32.totalorder %s787_s30, %s783_s11 }
 0x13b   : > { %p785_p2 = pnand %p784_p5, %p1081_p11 }
 0x13c   : > { %p790_p8 = por %p789_p6, %p788_p4 }
 0x13d   : > { %p786_p1 = pneg %p785_p2 }
 0x13f   : > { %p791_p3 = pnand %p790_p8, %p786_p1 }
 0x141   : > { %794 = shalt.err (!%p791_p3)
}
 0x142   : > { %s844_s20 = smov 64   ;;  %s845_s28 = smov 4  }
 0x143   : > { %648 = dma.vmem_to_hbm [thread:$0]  (%p1081_p11), %s1014_s29, 512, %s1019_s4, %s424_s16, %s844_s20, %s844_s20, %s845_s28  }
 0x144 PF: > { %s452_s17 = sand.u32 1, %s825_s12   ;;  %p1082_p7 = scmp.ne.s32.totalorder %s1071_s19, 0 }
 0x145   : > { %p1083_p9 = scmp.ge.s32.totalorder %s837_s15, 2  ;;  %s453_s22 = scalar_lea.sflag [#allocation4], %s452_s17 }
 0x147   : > { %p659_p10 = pnand %p1083_p9, %p1082_p7 }
 0x149   : > { %p660_p12 = pneg %p659_p10 }
 0x14b   : > { %820 = dma.done.wait (%p660_p12), %s453_s22, 512  }
 0x14c   : > { %822 = vsyncadd (%p660_p12), %s453_s22, 4294966784  ;;  %p17_p13 = scmp.ge.s32.totalorder %s920_s24, 4   ;;  %s1084_s12 = smov %s829_s13 }
 0x14d   : > { %s1085_s13 = smov %s833_s14  ;;  %s1086_s14 = smov %s940_s5 }
 0x14e   : > { %s1087_s15 = smov %s920_s24  ;;  %19 = sbr.rel (!%p17_p13) target bundleno = 6 (0x6), region = 81 }
 0x153   :  { %458 = vsyncpa [#allocation3], 1 }
 0x154   :  { %460 = vsyncpa [#allocation3 + $0x1], 1 }
 0x155   :  { %461 = vsyncpa [#allocation6], 1 }
 0x156   :  { %462 = vsyncpa [#allocation4], 1 }
 0x157   :  { %464 = vsyncpa [#allocation4 + $0x1], 1 }

</bundles_post_ra>
